<compile_context>
chip_gen: v7x
topology: tpu7x:2x2x1
jax: 0.10.0
libtpu: 0.0.40
codegen_flags: <defaults>
</compile_context>

<pallas_src>
import jax
import jax.numpy as jnp
import numpy as np
from jax.experimental import pallas as pl
from jax.experimental.pallas import tpu as pltpu

_MIB = 1 << 20

# Per-generation knobs (bytes / tile caps).
_VMEM_BUDGET = {"v5e": 100 * _MIB, "v6e": 100 * _MIB, "v7x": 48 * _MIB}
_VMEM_CAP = {"v5e": 110 * _MIB, "v6e": 110 * _MIB, "v7x": 56 * _MIB}
_TM_CAP = {"v5e": 512, "v6e": 1024, "v7x": 512}
_TF_CAP = 2048


def _gelu_tanh(x):
    # tanh-approx GELU (GPT-2 / nanoGPT form); EUP tanh, VPU elementwise.
    c = jnp.float32(0.7978845608028654)  # sqrt(2/pi)
    return 0.5 * x * (1.0 + jnp.tanh(c * (x + 0.044715 * x * x * x)))


def _ffn_kernel(x_ref, wup_ref, bup_ref, wdn_ref, bdn_ref, o_ref, acc_ref):
    """Grid step (i, j): row tile i, FF (intermediate) tile j.

    x_ref   : (tm, H)   compute dtype (bf16 or f32)
    wup_ref : (H, tf)   pre-transposed up-projection slice
    bup_ref : (1, tf)   f32
    wdn_ref : (tf, H)   pre-transposed down-projection slice
    bdn_ref : (1, H)    f32
    o_ref   : (tm, H)   output tile (resident across the FF axis)
    acc_ref : (tm, H)   f32 VMEM accumulator
    """
    j = pl.program_id(1)

    @pl.when(j == 0)
    def _():
        acc_ref[...] = jnp.zeros_like(acc_ref)

    # Up-projection tile + bias + GELU, evaluated in f32.
    h = jnp.dot(x_ref[...], wup_ref[...], preferred_element_type=jnp.float32)
    h = _gelu_tanh(h + bup_ref[...])

    # Down-projection partial sum into the resident accumulator.
    acc_ref[...] += jnp.dot(h.astype(wdn_ref.dtype), wdn_ref[...],
                            preferred_element_type=jnp.float32)

    @pl.when(j == pl.num_programs(1) - 1)
    def _():
        o_ref[...] = (acc_ref[...] + bdn_ref[...]).astype(o_ref.dtype)


def _tpu_generation():
    try:
        kind = jax.devices()[0].device_kind.lower()
    except Exception:  # pragma: no cover
        return "unknown"
    if "v5 lite" in kind or "v5e" in kind or "v5lite" in kind:
        return "v5e"
    if "v6" in kind:
        return "v6e"
    if "v7" in kind:
        return "v7x"
    return "unknown"


def _vmem_footprint(tm, tf, H, cdt_bytes, w_bufs=2):
    """Approximate VMEM working set in bytes for one grid step."""
    x_buf = 2 * tm * H * cdt_bytes              # x tile, double-buffered
    wup = w_bufs * H * tf * cdt_bytes            # W_up^T slice
    wdn = w_bufs * tf * H * cdt_bytes            # W_down^T slice
    bias = 2 * tf * 4 + 2 * H * 4                # biases (f32)
    out_buf = 2 * tm * H * cdt_bytes             # output tile, double-buffered
    acc = tm * H * 4                             # f32 accumulator scratch
    gelu = 2 * tm * tf * 4                       # f32 GELU temp + compiler temps
    return x_buf + wup + wdn + bias + out_buf + acc + gelu


def _divisor_tiles(dim, align, cap):
    """Descending list of multiples of `align` that divide `dim` (<= cap)."""
    cands = [t for t in range(align, min(dim, cap) + 1, align) if dim % t == 0]
    if not cands:
        cands = [dim]  # full extent is always a legal block size
    return sorted(cands, reverse=True)


def _select_tiles(M, FF, H, gen, cdt_bytes):
    """Pick (tm, tf) largest-first against the per-generation VMEM budget."""
    budget = _VMEM_BUDGET.get(gen, 48 * _MIB)
    tm_cap = _TM_CAP.get(gen, 512)
    # Sublane alignment of tm depends on compute dtype packing (8/16/32 rows).
    sub_align = 8 * (4 // max(1, cdt_bytes))

    tm_cands = _divisor_tiles(M, sub_align, tm_cap)
    tf_cands = _divisor_tiles(FF, 128, _TF_CAP)

    # v7x: keep at least 2 row tiles so the "parallel" axis spans both TCs.
    if gen == "v7x":
        two = [t for t in tm_cands if M // t >= 2]
        if two:
            tm_cands = two

    for tm in tm_cands:            # prefer large tm (arithmetic intensity) ...
        for tf in tf_cands:        # ... then the largest tf that still fits
            if _vmem_footprint(tm, tf, H, cdt_bytes) <= budget:
                return tm, tf
    return tm_cands[-1], tf_cands[-1]  # tiny-shape fallback (always fits)


def _weight_spec(block_shape, index_map, buffer_count):
    """BlockSpec for a weight slice, optionally 3-deep buffered (v6e)."""
    if buffer_count and buffer_count > 2:
        try:
            return pl.BlockSpec(block_shape, index_map,
                                pipeline_mode=pl.Buffered(buffer_count))
        except TypeError:  # older API without pipeline_mode
            pass
    return pl.BlockSpec(block_shape, index_map)


def prepare_ffn_weights(w_up, b_up, w_down, b_down, compute_dtype=jnp.bfloat16):
    """One-time (model-init) layout work: transpose to (in, out) + cast.

    Hoisted out of the per-call path so each FFN invocation does not pay an
    extra HBM round trip over 2*H*FF elements for transpose/cast XLA ops.
    """
    wup_t = jnp.transpose(w_up).astype(compute_dtype)     # (H, FF)
    wdn_t = jnp.transpose(w_down).astype(compute_dtype)   # (FF, H)
    bup2 = b_up.reshape(1, -1).astype(jnp.float32)        # (1, FF)
    bdn2 = b_down.reshape(1, -1).astype(jnp.float32)      # (1, H)
    return wup_t, bup2, wdn_t, bdn2


def ffn_apply(x, wup_t, bup2, wdn_t, bdn2, *, tm=None, tf=None):
    """Fused FFN forward. x: (B, S, H); weights pre-transposed/pre-cast.

    Returns (B, S, H) in x.dtype. Matches Dropout(eval)(down(GELU(up(x)))).
    """
    B, S, H = x.shape
    FF = wup_t.shape[1]
    M = B * S
    compute_dtype = wup_t.dtype
    cdt_bytes = np.dtype(compute_dtype).itemsize

    x2 = x.reshape(M, H).astype(compute_dtype)

    gen = _tpu_generation()
    tm_auto, tf_auto = _select_tiles(M, FF, H, gen, cdt_bytes)
    tm = tm_auto if tm is None else tm
    tf = tf_auto if tf is None else tf
    assert M % tm == 0 and FF % tf == 0, (M, tm, FF, tf)

    # v6e: third buffer on the weight slices when tm is large enough that the
    # per-step weight DMA rivals the per-step MXU time (and VMEM allows it).
    budget = _VMEM_BUDGET.get(gen, 48 * _MIB)
    w_bufs = 2
    if gen == "v6e" and tm >= 512:
        if _vmem_footprint(tm, tf, H, cdt_bytes, w_bufs=3) <= budget:
            w_bufs = 3

    footprint = _vmem_footprint(tm, tf, H, cdt_bytes, w_bufs=w_bufs)
    vmem_cap = _VMEM_CAP.get(gen, 56 * _MIB)
    vmem_limit = int(min(vmem_cap, max(footprint * 5 // 4, 32 * _MIB)))

    grid = (M // tm, FF // tf)

    out = pl.pallas_call(
        _ffn_kernel,
        out_shape=jax.ShapeDtypeStruct((M, H), x.dtype),
        grid_spec=pltpu.PrefetchScalarGridSpec(
            num_scalar_prefetch=0,
            grid=grid,
            in_specs=[
                pl.BlockSpec((tm, H), lambda i, j: (i, 0)),            # x rows
                _weight_spec((H, tf), lambda i, j: (0, j), w_bufs),    # W_up^T
                pl.BlockSpec((1, tf), lambda i, j: (0, j)),            # b_up
                _weight_spec((tf, H), lambda i, j: (j, 0), w_bufs),    # W_dn^T
                pl.BlockSpec((1, H), lambda i, j: (0, 0)),             # b_down
            ],
            out_specs=pl.BlockSpec((tm, H), lambda i, j: (i, 0)),
            scratch_shapes=[pltpu.VMEM((tm, H), jnp.float32)],
        ),
        compiler_params=pltpu.CompilerParams(
            dimension_semantics=("parallel", "arbitrary"),
            vmem_limit_bytes=vmem_limit),
    )(x2, wup_t, bup2, wdn_t, bdn2)
    return out.reshape(B, S, H)


def ffn(x, w_up, b_up, w_down, b_down, *, compute_dtype=jnp.bfloat16,
        tm=None, tf=None):
    """Convenience wrapper (prepares weights per call; prefer ffn_apply)."""
    params = prepare_ffn_weights(w_up, b_up, w_down, b_down, compute_dtype)
    return ffn_apply(x, *params, tm=tm, tf=tf)


def _reference(x, w_up, b_up, w_down, b_down):
    """Pure-JAX f32 reference mirroring the PyTorch forward (dropout = id)."""
    h = _gelu_tanh(x @ w_up.T + b_up)
    return h @ w_down.T + b_down


if __name__ == "__main__":
    # Small config consistent with the module (hidden -> 4*hidden -> hidden).
    B, S, hidden = 2, 8, 128
    ff = 4 * hidden  # 512

    key = jax.random.PRNGKey(0)
    ks = jax.random.split(key, 5)
    x = jax.random.normal(ks[0], (B, S, hidden), dtype=jnp.float32)

    scale = 0.02
    w_up = scale * jax.random.normal(ks[1], (ff, hidden), jnp.float32)
    b_up = scale * jax.random.normal(ks[2], (ff,), jnp.float32)
    w_down = scale * jax.random.normal(ks[3], (hidden, ff), jnp.float32)
    b_down = scale * jax.random.normal(ks[4], (hidden,), jnp.float32)

    ref = jax.block_until_ready(_reference(x, w_up, b_up, w_down, b_down))

    # f32 path with tf forced small to exercise the FF-reduction grid axis.
    params_f32 = prepare_ffn_weights(w_up, b_up, w_down, b_down, jnp.float32)
    out_f32 = jax.block_until_ready(ffn_apply(x, *params_f32, tf=128))
    np.testing.assert_allclose(np.asarray(out_f32), np.asarray(ref),
                               rtol=1e-4, atol=1e-4)

    # Default path: weights prepared ONCE (bf16, pre-transposed), auto tiles.
    params_bf16 = prepare_ffn_weights(w_up, b_up, w_down, b_down, jnp.bfloat16)
    out_bf16 = jax.block_until_ready(ffn_apply(x, *params_bf16))
    np.testing.assert_allclose(np.asarray(out_bf16), np.asarray(ref),
                               rtol=3e-2, atol=3e-3)

    print("KERNEL_OK")
</pallas_src>

<mosaic_0001>
module attributes {stable_mosaic.version = 11 : i64} {
  func.func @_ffn_kernel(%arg0: i32, %arg1: i32, %arg2: memref<16x128xf32, #tpu.memory_space<vmem>>, %arg3: memref<128x128xf32, #tpu.memory_space<vmem>>, %arg4: memref<1x128xf32, #tpu.memory_space<vmem>>, %arg5: memref<128x128xf32, #tpu.memory_space<vmem>>, %arg6: memref<1x128xf32, #tpu.memory_space<vmem>>, %arg7: memref<16x128xf32, #tpu.memory_space<vmem>>, %arg8: memref<16x128xf32, #tpu.memory_space<vmem>>) attributes {dimension_semantics = [#tpu.dimension_semantics<parallel>, #tpu.dimension_semantics<arbitrary>], iteration_bounds = array<i64: 1, 4>, scalar_prefetch = 0 : i64, scratch_operands = 1 : i64, tpu.core_type = #tpu.core_type<tc>, window_params = [{transform_indices = @transform_0, window_bounds = array<i64: 16, 128>}, {transform_indices = @transform_1, window_bounds = array<i64: 128, 128>}, {transform_indices = @transform_2, window_bounds = array<i64: 1, 128>}, {transform_indices = @transform_3, window_bounds = array<i64: 128, 128>}, {pipeline_mode = #tpu.pipeline_mode<synchronous>, transform_indices = @transform_4, window_bounds = array<i64: 1, 128>}, {transform_indices = @transform_5, window_bounds = array<i64: 16, 128>}]} {
    %c0_i32 = arith.constant 0 : i32
    %0 = arith.cmpi eq, %arg1, %c0_i32 : i32
    %1 = arith.extui %0 : i1 to i32
    %c0_i32_0 = arith.constant 0 : i32
    %2 = arith.cmpi ne, %1, %c0_i32_0 : i32
    scf.if %2 {
      %cst_18 = arith.constant 0.000000e+00 : f32
      %30 = vector.broadcast %cst_18 : f32 to vector<16x128xf32>
      %c0_19 = arith.constant 0 : index
      %c0_20 = arith.constant 0 : index
      %31 = vector.load %arg8[%c0_19, %c0_20] : memref<16x128xf32, #tpu.memory_space<vmem>>, vector<16x128xf32>
      tpu.vector_store %arg8[%c0_19, %c0_20], %30 {strides = array<i32>} : memref<16x128xf32, #tpu.memory_space<vmem>>, vector<16x128xf32>,
    } else {
    }
    %c0 = arith.constant 0 : index
    %c0_1 = arith.constant 0 : index
    %3 = vector.load %arg2[%c0, %c0_1] : memref<16x128xf32, #tpu.memory_space<vmem>>, vector<16x128xf32>
    %c0_2 = arith.constant 0 : index
    %c0_3 = arith.constant 0 : index
    %4 = vector.load %arg3[%c0_2, %c0_3] : memref<128x128xf32, #tpu.memory_space<vmem>>, vector<128x128xf32>
    %cst = arith.constant dense<0.000000e+00> : vector<16x128xf32>
    %5 = tpu.matmul %3, %4, %cst {dimension_numbers = #tpu.dot_dimension_numbers<[1], [0], [0], [1], [0, 0, 1, 1], [], []>} : vector<16x128xf32>, vector<128x128xf32>, vector<16x128xf32> -> vector<16x128xf32>
    %c0_4 = arith.constant 0 : index
    %c0_5 = arith.constant 0 : index
    %6 = vector.load %arg4[%c0_4, %c0_5] : memref<1x128xf32, #tpu.memory_space<vmem>>, vector<1x128xf32>
    %7 = vector.broadcast %6 : vector<1x128xf32> to vector<16x128xf32>
    %8 = arith.addf %5, %7 : vector<16x128xf32>
    %cst_6 = arith.constant 5.000000e-01 : f32
    %9 = vector.broadcast %cst_6 : f32 to vector<16x128xf32>
    %10 = arith.mulf %9, %8 : vector<16x128xf32>
    %cst_7 = arith.constant 4.471500e-02 : f32
    %11 = vector.broadcast %cst_7 : f32 to vector<16x128xf32>
    %12 = arith.mulf %11, %8 : vector<16x128xf32>
    %13 = arith.mulf %12, %8 : vector<16x128xf32>
    %14 = arith.mulf %13, %8 : vector<16x128xf32>
    %15 = arith.addf %8, %14 : vector<16x128xf32>
    %cst_8 = arith.constant 0.797884583 : f32
    %16 = vector.broadcast %cst_8 : f32 to vector<16x128xf32>
    %17 = arith.mulf %16, %15 : vector<16x128xf32>
    %18 = math.tanh %17 : vector<16x128xf32>
    %cst_9 = arith.constant 1.000000e+00 : f32
    %19 = vector.broadcast %cst_9 : f32 to vector<16x128xf32>
    %20 = arith.addf %19, %18 : vector<16x128xf32>
    %21 = arith.mulf %10, %20 : vector<16x128xf32>
    %c0_10 = arith.constant 0 : index
    %c0_11 = arith.constant 0 : index
    %22 = vector.load %arg8[%c0_10, %c0_11] : memref<16x128xf32, #tpu.memory_space<vmem>>, vector<16x128xf32>
    %c0_12 = arith.constant 0 : index
    %c0_13 = arith.constant 0 : index
    %23 = vector.load %arg5[%c0_12, %c0_13] : memref<128x128xf32, #tpu.memory_space<vmem>>, vector<128x128xf32>
    %cst_14 = arith.constant dense<0.000000e+00> : vector<16x128xf32>
    %24 = tpu.matmul %21, %23, %cst_14 {dimension_numbers = #tpu.dot_dimension_numbers<[1], [0], [0], [1], [0, 0, 1, 1], [], []>} : vector<16x128xf32>, vector<128x128xf32>, vector<16x128xf32> -> vector<16x128xf32>
    %25 = arith.addf %22, %24 : vector<16x128xf32>
    %c0_15 = arith.constant 0 : index
    %c0_16 = arith.constant 0 : index
    %26 = vector.load %arg8[%c0_15, %c0_16] : memref<16x128xf32, #tpu.memory_space<vmem>>, vector<16x128xf32>
    tpu.vector_store %arg8[%c0_15, %c0_16], %25 {strides = array<i32>} : memref<16x128xf32, #tpu.memory_space<vmem>>, vector<16x128xf32>,
    %c3_i32 = arith.constant 3 : i32
    %27 = arith.cmpi eq, %arg1, %c3_i32 : i32
    %28 = arith.extui %27 : i1 to i32
    %c0_i32_17 = arith.constant 0 : i32
    %29 = arith.cmpi ne, %28, %c0_i32_17 : i32
    scf.if %29 {
      %c0_18 = arith.constant 0 : index
      %c0_19 = arith.constant 0 : index
      %30 = vector.load %arg8[%c0_18, %c0_19] : memref<16x128xf32, #tpu.memory_space<vmem>>, vector<16x128xf32>
      %c0_20 = arith.constant 0 : index
      %c0_21 = arith.constant 0 : index
      %31 = vector.load %arg6[%c0_20, %c0_21] : memref<1x128xf32, #tpu.memory_space<vmem>>, vector<1x128xf32>
      %32 = vector.broadcast %31 : vector<1x128xf32> to vector<16x128xf32>
      %33 = arith.addf %30, %32 : vector<16x128xf32>
      %c0_22 = arith.constant 0 : index
      %c0_23 = arith.constant 0 : index
      %34 = vector.load %arg7[%c0_22, %c0_23] : memref<16x128xf32, #tpu.memory_space<vmem>>, vector<16x128xf32>
      tpu.vector_store %arg7[%c0_22, %c0_23], %33 {strides = array<i32>} : memref<16x128xf32, #tpu.memory_space<vmem>>, vector<16x128xf32>,
    } else {
    }
    return
  }
  func.func @transform_0(%arg0: i32, %arg1: i32) -> (i32, i32) {
    %c0_i32 = arith.constant 0 : i32
    %c0_i32_0 = arith.constant 0 : i32
    return %arg0, %c0_i32 : i32, i32
  }
  func.func @transform_1(%arg0: i32, %arg1: i32) -> (i32, i32) {
    %c0_i32 = arith.constant 0 : i32
    %c0_i32_0 = arith.constant 0 : i32
    return %c0_i32, %arg1 : i32, i32
  }
  func.func @transform_2(%arg0: i32, %arg1: i32) -> (i32, i32) {
    %c0_i32 = arith.constant 0 : i32
    %c0_i32_0 = arith.constant 0 : i32
    return %c0_i32, %arg1 : i32, i32
  }
  func.func @transform_3(%arg0: i32, %arg1: i32) -> (i32, i32) {
    %c0_i32 = arith.constant 0 : i32
    %c0_i32_0 = arith.constant 0 : i32
    return %arg1, %c0_i32 : i32, i32
  }
  func.func @transform_4(%arg0: i32, %arg1: i32) -> (i32, i32) {
    %c0_i32 = arith.constant 0 : i32
    %c0_i32_0 = arith.constant 0 : i32
    %c0_i32_1 = arith.constant 0 : i32
    return %c0_i32, %c0_i32_0 : i32, i32
  }
  func.func @transform_5(%arg0: i32, %arg1: i32) -> (i32, i32) {
    %c0_i32 = arith.constant 0 : i32
    %c0_i32_0 = arith.constant 0 : i32
    return %arg0, %c0_i32 : i32, i32
  }
}

</mosaic_0001>

<bundles_post_ra>
// kernel: tpu_custom_call.1
= control target key start
LH: loop header
LB: loop body
LE: loop exit
PB: predicated region body
PF: predicated region fallthrough
CT: control target
= control target key end

     0   :  { %10 = vsyncpa [#allocation4], 0  ;;  %s1463_s0 = inlined_call_operand.hbm [shape: f32[16,128], index: 0, kind: input, shape index: {}]   ;;  %s1464_s1 = inlined_call_operand.hbm [shape: f32[128,512], index: 1, kind: input, shape index: {}]   ;;  %s1465_s2 = inlined_call_operand.vmem [shape: f32[1,512], index: 2, kind: input, shape index: {}]   ;;  %s1466_s3 = inlined_call_operand.hbm [shape: f32[512,128], index: 3, kind: input, shape index: {}]   ;;  %s1467_s4 = inlined_call_operand.vmem [shape: f32[1,128], index: 4, kind: input, shape index: {}]   ;;  %s1468_s5 = inlined_call_operand.hbm [shape: f32[16,128], index: 5, kind: output, shape index: {}]  }
   0x1   :  { %11 = vsyncpa [#allocation7], 0 }
   0x2   :  { %13 = vsyncpa [#allocation7 + $0x1], 0 }
   0x3   :  { %14 = vsyncpa [#allocation5], 0  ;;  %s1172_s18 = smov 0   ;;  %s1174_s19 = smov 0  }
   0x4   :  { %s1176_s20 = smov 0   ;;  %s1178_s21 = smov 0  }
   0x5   :  { %s1180_s22 = smov 0   ;;  %s1182_s23 = smov 0  }
   0x6 LB: > { %s29_s24 = sadd.s32 1, %s1126_s22  ;;  %s65_s25 = sadd.s32 1, %s1118_s20  ;;  %s1130_s23 = sphi %s1182_s23, %s20_s23   ;;  %s1126_s22 = sphi %s1180_s22, %s1485_s22   ;;  %s1122_s21 = sphi %s1178_s21, %s1484_s21   ;;  %s1118_s20 = sphi %s1176_s20, %s1483_s20   ;;  %s1114_s19 = sphi %s1174_s19, %s1482_s19   ;;  %s1110_s18 = sphi %s1172_s18, %s1481_s18  }
   0x7   : > { %p30_p0 = scmp.ge.s32.totalorder %s29_s24, 4  ;;  %p72_p1 = scmp.ne.s32.totalorder %s1118_s20, %s1114_s19 }
   0x8   : > { %p73_p2 = scmp.eq.s32.totalorder %s1130_s23, 0  ;;  %p894_p5 = scmp.lt.s32.totalorder %s1130_s23, 4 }
   0x9   : > { %s1487_s24 = smov (%p30_p0, %s29_s24), 0  ;;  %s220_s28 = sand.u32 1, %s1130_s23  }
   0xa   : > { %p1209_p3 = por %p73_p2, %p72_p1  ;;  %s62_s27 = ssub.s32 %s1126_s22, %s1487_s24 }
   0xb   : > { %p63_p4 = scmp.eq.s32.totalorder %s62_s27, 0  ;;  %s222_s29 = sand.u32 1, %s1118_s20  }
   0xc   : > { %s1221_s6 = sshll.u32 %s222_s29, 7  ;;  %s683_s7 = sshll.u32 %s1126_s22, 7 }
   0xd   : > { %s1219_s30 = scalar_select %p63_p4, %s1118_s20, %s65_s25  }
   0xe   : > { %s1227_s10 = scalar_lea.hbm %s1464_s1, %s683_s7  ;;  %s224_s11 = scalar_lea.vmem [#allocation6], %s1221_s6 }
   0xf   : > { %s230_s12 = sshll.u32 %s224_s11, 4  ;;  %p1234_p6 = pnand %p894_p5, %p1209_p3  ;;  %s1230_s12 = int_to_ptr.vmem [resolvable:$true] %s230_s12 }
  0x10   : > { %s1238_s14 = scalar_lea.sflag [#allocation7], %s220_s28  ;;  %s958_s15 = scalar_lea.hbm %s1227_s10, 2048 }
  0x11   : > { %p959_p7 = scmp.ne.s32.totalorder %s1227_s10, %s958_s15  ;;  %p960_p8 = pneg %p1234_p6 }
  0x12   : > { %s963_s25 = scalar_lea.hbm %s1464_s1, 8192  ;;  %p964_p11 = scmp.lt.u32.totalorder %s1227_s10, %s1464_s1 }
  0x13   : > { %p961_p9 = pnand %p960_p8, %p959_p7  ;;  %p965_p12 = scmp.lt.u32.totalorder %s963_s25, %s958_s15 }
  0x14   : > { %p967_p0 = scmp.lt.u32.totalorder %s958_s15, %s1227_s10 }
  0x15   : > { %p962_p10 = pneg %p961_p9  ;;  %p966_p13 = por %p965_p12, %p964_p11 }
  0x17   : > { %p968_p1 = por %p967_p0, %p966_p13 }
  0x19   : > { %p969_p2 = pnand %p968_p1, %p962_p10 }
  0x1b   : > { %972 = shalt.err (!%p969_p2)
}
  0x1c   : > { %s973_s28 = scalar_lea.vmem %s1230_s12, 2048  ;;  %s1132_s29 = smov [#allocation6]  }
  0x1d   : > { %p974_p3 = scmp.ne.s32.totalorder %s1230_s12, %s973_s28  ;;  %s978_s7 = sshll.u32 %s1132_s29, 4  ;;  %s979_s7 = int_to_ptr.vmem [resolvable:$false] %s978_s7 }
  0x1e   : > { %s980_s8 = scalar_lea.vmem %s979_s7, 4096  ;;  %p981_p7 = scmp.lt.s32.totalorder %s1230_s12, %s979_s7 }
  0x1f   : > { %p976_p4 = pnand %p974_p3, %p960_p8  ;;  %p982_p9 = scmp.lt.s32.totalorder %s980_s8, %s973_s28 }
  0x21   : > { %p977_p5 = pneg %p976_p4  ;;  %p983_p11 = por %p982_p9, %p981_p7 }
  0x23   : > { %p984_p12 = pnand %p983_p11, %p977_p5 }
  0x25   : > { %987 = shalt.err (!%p984_p12)
}
  0x26   : > { %s1133_s9 = smov 512   ;;  %s1134_s11 = smov 128  }
  0x27   : > { %s1135_s15 = smov 8   ;;  %s1269_s16 = sadd.s32 4294967295, %s1130_s23  }
  0x28   : > { %889 = dma.hbm_to_vmem [thread:$0]  (!%p1234_p6), %s1227_s10, 2048, %s1230_s12, %s1238_s14, %s1133_s9, %s1134_s11, %s1135_s15  }
  0x29   : > { %p78_p10 = scmp.ne.s32.totalorder %s1114_s19, %s1110_s18  ;;  %p1469_p13 = scmp.eq.s32.totalorder %s1269_s16, 0 }
  0x2a   : > { %p679_p0 = scmp.ge.s32.totalorder %s1130_s23, 1  ;;  %p188_p1 = scmp.lt.s32.totalorder %s1130_s23, 5 }
  0x2b   : > { %p1278_p2 = por %p1469_p13, %p78_p10  ;;  %s1136_s10 = smov [#allocation3]  }
  0x2c   : > { %p1282_p3 = pnand %p679_p0, %p188_p1  ;;  %s203_s12 = sshll.u32 %s1136_s10, 4  ;;  %s1286_s12 = int_to_ptr.vmem [resolvable:$true] %s203_s12 }
  0x2d   : > { %s1474_s17 = scalar_select %p1278_p2, 1, 0 }
  0x2e   : > { %s1475_s25 = scalar_select %p1282_p3, 1, 0 }
  0x2f   : > { %p882_p4 = pneg %p1282_p3  ;;  %s699_s18 = sshll.u32 %s1126_s22, 11 }
  0x30   : > { %s1294_s28 = scalar_lea.hbm %s1466_s3, %s699_s18  ;;  %s250_s29 = scalar_lea.vmem [#allocation8], %s1221_s6 }
  0x31   : > { %s257_s7 = sshll.u32 %s250_s29, 4  ;;  %p1299_p5 = pnand %p882_p4, %p1469_p13  ;;  %s1303_s7 = int_to_ptr.vmem [resolvable:$true] %s257_s7 }
  0x32   : > { %s988_s9 = scalar_lea.hbm %s1294_s28, 2048  ;;  %s993_s26 = scalar_lea.hbm %s1466_s3, 8192 }
  0x33   : > { %p989_p7 = scmp.ne.s32.totalorder %s1294_s28, %s988_s9  ;;  %p994_p12 = scmp.lt.u32.totalorder %s1294_s28, %s1466_s3 }
  0x34   : > { %p995_p10 = scmp.lt.u32.totalorder %s993_s26, %s988_s9  ;;  %p997_p1 = scmp.lt.u32.totalorder %s988_s9, %s1294_s28 }
  0x35   : > { %p991_p9 = pnand %p989_p7, %p960_p8 }
  0x36   : > { %p996_p0 = por %p995_p10, %p994_p12 }
  0x37   : > { %p992_p11 = pneg %p991_p9 }
  0x38   : > { %p998_p4 = por %p997_p1, %p996_p0 }
  0x3a   : > { %p999_p13 = pnand %p998_p4, %p992_p11 }
  0x3c   : > { %1002 = shalt.err (!%p999_p13)
}
  0x3d   : > { %s1003_s29 = scalar_lea.vmem %s1303_s7, 2048  ;;  %s1137_s10 = smov [#allocation8]  }
  0x3e   : > { %p1004_p7 = scmp.ne.s32.totalorder %s1303_s7, %s1003_s29  ;;  %s1008_s18 = sshll.u32 %s1137_s10, 4  ;;  %s1009_s18 = int_to_ptr.vmem [resolvable:$false] %s1008_s18 }
  0x3f   : > { %s1010_s27 = scalar_lea.vmem %s1009_s18, 4096  ;;  %p1011_p3 = scmp.lt.s32.totalorder %s1303_s7, %s1009_s18 }
  0x40   : > { %p1006_p9 = pnand %p1004_p7, %p960_p8  ;;  %p1012_p12 = scmp.lt.s32.totalorder %s1010_s27, %s1003_s29 }
  0x42   : > { %p1007_p2 = pneg %p1006_p9  ;;  %p1013_p10 = por %p1012_p12, %p1011_p3 }
  0x44   : > { %p1014_p0 = pnand %p1013_p10, %p1007_p2 }
  0x46   : > { %1017 = shalt.err (!%p1014_p0)
}
  0x47   : > { %892 = dma.hbm_to_vmem [thread:$0]  (!%p1234_p6), %s1294_s28, 2048, %s1303_s7, %s1238_s14, %s1134_s11, %s1134_s11, %s1135_s15  }
  0x48   : > { %s1018_s6 = scalar_lea.hbm %s1463_s0, 256  ;;  %p1020_p13 = pneg %p1299_p5 }
  0x49   : > { %p1019_p8 = scmp.ne.s32.totalorder %s1463_s0, %s1018_s6  ;;  %p1025_p11 = scmp.lt.u32.totalorder %s1018_s6, %s1463_s0 }
  0x4b   : > { %p1021_p2 = pnand %p1020_p13, %p1019_p8 }
  0x4d   : > { %p1022_p3 = pneg %p1021_p2 }
  0x4f   : > { %p1027_p1 = pnand %p1025_p11, %p1022_p3 }
  0x51   : > { %1030 = shalt.err (!%p1027_p1)
}
  0x52   : > { %s1031_s14 = scalar_lea.vmem %s1286_s12, 256  ;;  %p1039_p9 = scmp.lt.s32.totalorder %s1286_s12, %s1286_s12 }
  0x53   : > { %p1032_p6 = scmp.ne.s32.totalorder %s1286_s12, %s1031_s14  ;;  %p1040_p12 = scmp.lt.s32.totalorder %s1031_s14, %s1031_s14 }
  0x55   : > { %p1034_p4 = pnand %p1032_p6, %p1020_p13  ;;  %p1041_p10 = por %p1040_p12, %p1039_p9 }
  0x57   : > { %p1035_p7 = pneg %p1034_p4 }
  0x59   : > { %p1042_p0 = pnand %p1041_p10, %p1035_p7 }
  0x5b   : > { %1045 = shalt.err (!%p1042_p0)
}
  0x5c   : > { %885 = dma.hbm_to_vmem [thread:$0]  (!%p1299_p5), %s1463_s0, 256, %s1286_s12, [#allocation4], %s1134_s11, %s1134_s11, %s1135_s15  }
  0x5d   : > { %p1477_p8 = scmp.ne.s32.totalorder %s1475_s25, 0 }
  0x5e   : > { %p1478_p13 = scmp.eq.s32.totalorder (!%p1477_p8), %s1269_s16, 0 }
  0x5f   : > { %269 = sbr.rel (%p1477_p8) target bundleno = 646 (0x286), region = 40 }
  0x66   : > { %1097 = dma.done.wait (%p1478_p13), [#allocation4], 256   ;;  %p1479_p2 = pmov %p1478_p13 }
  0x67   : > { %s275_s8 = sand.u32 1, %s1269_s16   ;;  %s277_s27 = sand.u32 1, %s1114_s19  }
  0x68   : > { %1099 = vsyncadd (%p1479_p2), [#allocation4], 4294967040  ;;  %s689_s9 = sshll.u32 %s277_s27, 7  ;;  %s276_s26 = scalar_lea.sflag [#allocation7], %s275_s8 }
  0x69   : > { %s1364_s6 = scalar_lea.vmem [#allocation6], %s689_s9  ;;  %p1480_p3 = scmp.ne.s32.totalorder %s1474_s17, 0 }
  0x6b   : > { %1101 = dma.done.wait (%p1480_p3), %s276_s26, 4096  }
  0x6c   : > { %1103 = vsyncadd (%p1480_p3), %s276_s26, 4294963200  ;;  %p319_p5 = scmp.lt.s32.totalorder %s1122_s21, 3  ;;  %s1378_s10 = scalar_lea.vmem [#allocation8], %s689_s9 }
  0x6d   : > { %p691_p11 = scmp.ne.s32.totalorder %s1122_s21, 0 }
  0x6e   : > { %s1372_s11 = scalar_select %p319_p5, %s1122_s21, 3 }
  0x6f   : > { %327 = sbr.rel (%p691_p11) target bundleno = 118 (0x76), region = 56  ;;  %v1138_v0 = vmov (!%p691_p11), 0.0  }
  0x70   : > { %s321_s12 = scalar_lea.vmem %s1465_s2, %s1372_s11  ;;  %328 = vst [vmem:[#allocation2] sm:$0xff] (!%p691_p11), %v1138_v0  ;;  %329 = vst [vmem:[#allocation2 + $0x8] sm:$0xff] (!%p691_p11), %v1138_v0 }
  0x76 PF: > { %v332_v1 = vld [vmem:[%s1364_s6] sm:$0xff]  ;;  %v333_v2 = vld [vmem:[%s1364_s6 + $0x8] sm:$0xff]  ;;  %v334_v3 = vld [vmem:[%s1364_s6 + $0x10] sm:$0xff]  ;;  %p693_p1 = scmp.ne.s32.totalorder %s1122_s21, 3 }
  0x77   : > { %v806_v4 = vpack.c.bf16 %v333_v2, %v332_v1  ;;  %v335_v5 = vld [vmem:[%s1364_s6 + $0x18] sm:$0xff]  ;;  %v336_v7 = vld [vmem:[%s1364_s6 + $0x20] sm:$0xff]  ;;  %v337_v8 = vld [vmem:[%s1364_s6 + $0x28] sm:$0xff] }
  0x78   : > { %v810_v6 = vpack.c.bf16 %v335_v5, %v334_v3  ;;  %v814_v9 = vpack.c.bf16 %v337_v8, %v336_v7  ;;  %v338_v10 = vld [vmem:[%s1364_s6 + $0x30] sm:$0xff]  ;;  %v339_v12 = vld [vmem:[%s1364_s6 + $0x38] sm:$0xff]  ;;  %v450_v13 = vld [vmem:[%s1378_s10] sm:$0xff] }
  0x79   : > { %807 = vmatprep.subr.bf16.mxu0 %v806_v4  ;;  %v330_v11 = vld [vmem:[#allocation3] sm:$0xff]  ;;  %v451_v14 = vld [vmem:[%s1378_s10 + $0x8] sm:$0xff]  ;;  %v818_v16 = vpack.c.bf16 %v339_v12, %v338_v10  ;;  %v340_v17 = vld [vmem:[%s1364_s6 + $0x40] sm:$0xff] }
  0x7a   : > { %809 = vmatpush3.bf16.msra.mxu0 %v806_v4  ;;  %768 = vmatprep.mubr.f32.mxu0 %v330_v11  ;;  %v838_v15 = vpack.c.bf16 %v451_v14, %v450_v13  ;;  %v341_v18 = vld [vmem:[%s1364_s6 + $0x48] sm:$0xff]  ;;  %v342_v20 = vld [vmem:[%s1364_s6 + $0x50] sm:$0xff]  ;;  %v343_v21 = vld [vmem:[%s1364_s6 + $0x58] sm:$0xff] }
  0x7b   : > { %811 = vmatprep.subr.bf16.mxu0 %v810_v6  ;;  %v822_v19 = vpack.c.bf16 %v341_v18, %v340_v17  ;;  %v826_v22 = vpack.c.bf16 %v343_v21, %v342_v20  ;;  %v344_v23 = vld [vmem:[%s1364_s6 + $0x60] sm:$0xff]  ;;  %v345_v24 = vld [vmem:[%s1364_s6 + $0x68] sm:$0xff]  ;;  %v346_v26 = vld [vmem:[%s1364_s6 + $0x70] sm:$0xff] }
  0x7c   : > { %839 = vmatprep.subr.bf16.mxu1 %v838_v15  ;;  %v830_v25 = vpack.c.bf16 %v345_v24, %v344_v23  ;;  %v347_v27 = vld [vmem:[%s1364_s6 + $0x78] sm:$0xff]  ;;  %v452_v30 = vld [vmem:[%s1378_s10 + $0x10] sm:$0xff]  ;;  %v454_v33 = vld [vmem:[%s1378_s10 + $0x20] sm:$0xff] }
  0x7d   : > { %841 = vmatpush3.bf16.msra.mxu1 %v838_v15  ;;  %v834_v28 = vpack.c.bf16 %v347_v27, %v346_v26  ;;  %v331_v29 = vld [vmem:[#allocation3 + $0x8] sm:$0xff]  ;;  %v455_v34 = vld [vmem:[%s1378_s10 + $0x28] sm:$0xff]  ;;  %v456_v36 = vld [vmem:[%s1378_s10 + $0x30] sm:$0xff] }
  0x7e   : > { %813 = vmatpush3.bf16.msra.mxu0 %v810_v6  ;;  %v453_v31 = vld [vmem:[%s1378_s10 + $0x18] sm:$0xff]  ;;  %v846_v35 = vpack.c.bf16 %v455_v34, %v454_v33  ;;  %v458_v38 = vld [vmem:[%s1378_s10 + $0x40] sm:$0xff]  ;;  %v459_v40 = vld [vmem:[%s1378_s10 + $0x48] sm:$0xff] }
  0x7f   : > { %815 = vmatprep.subr.bf16.mxu0 %v814_v9  ;;  %v842_v32 = vpack.c.bf16 %v453_v31, %v452_v30  ;;  %v457_v37 = vld [vmem:[%s1378_s10 + $0x38] sm:$0xff]  ;;  %v854_v41 = vpack.c.bf16 %v459_v40, %v458_v38  ;;  %v460_v42 = vld [vmem:[%s1378_s10 + $0x50] sm:$0xff]  ;;  %v462_v45 = vld [vmem:[%s1378_s10 + $0x60] sm:$0xff] }
  0x80   : > { %v850_v39 = vpack.c.bf16 %v457_v37, %v456_v36  ;;  %v461_v43 = vld [vmem:[%s1378_s10 + $0x58] sm:$0xff]  ;;  %v463_v46 = vld [vmem:[%s1378_s10 + $0x68] sm:$0xff]  ;;  %v464_v48 = vld [vmem:[%s1378_s10 + $0x70] sm:$0xff] }
  0x81   : > { %843 = vmatprep.subr.bf16.mxu1 %v842_v32  ;;  %v858_v44 = vpack.c.bf16 %v461_v43, %v460_v42  ;;  %v862_v47 = vpack.c.bf16 %v463_v46, %v462_v45  ;;  %v465_v49 = vld [vmem:[%s1378_s10 + $0x78] sm:$0xff]  ;;  %v692_v51 = vld [vmem:[%s321_s12] ss:$0 sm:$0xff]  ;;  %v449_v10 = vld [vmem:[#allocation2 + $0x8] sm:$0xff] }
  0x82   : > { %817 = vmatpush3.bf16.msra.mxu0 %v814_v9  ;;  %845 = vmatpush3.bf16.msra.mxu1 %v842_v32  ;;  %v866_v50 = vpack.c.bf16 %v465_v49, %v464_v48  ;;  %v448_v11 = vld [vmem:[#allocation2] sm:$0xff] }
  0x83   : > { %819 = vmatprep.subr.bf16.mxu0 %v818_v16  ;;  %847 = vmatprep.subr.bf16.mxu1 %v846_v35  ;;  %v694_v17 = vld [vmem:[%s1467_s4] ss:$0 sm:$0xff] (!%p693_p1) }
  0x86   : > { %821 = vmatpush3.bf16.msra.mxu0 %v818_v16  ;;  %849 = vmatpush3.bf16.msra.mxu1 %v846_v35 }
  0x87   : > { %823 = vmatprep.subr.bf16.mxu0 %v822_v19  ;;  %851 = vmatprep.subr.bf16.mxu1 %v850_v39 }
  0x8a   : > { %825 = vmatpush3.bf16.msra.mxu0 %v822_v19  ;;  %853 = vmatpush3.bf16.msra.mxu1 %v850_v39 }
  0x8b   : > { %827 = vmatprep.subr.bf16.mxu0 %v826_v22  ;;  %855 = vmatprep.subr.bf16.mxu1 %v854_v41 }
  0x8e   : > { %829 = vmatpush3.bf16.msra.mxu0 %v826_v22  ;;  %857 = vmatpush3.bf16.msra.mxu1 %v854_v41 }
  0x8f   : > { %831 = vmatprep.subr.bf16.mxu0 %v830_v25  ;;  %859 = vmatprep.subr.bf16.mxu1 %v858_v44 }
  0x92   : > { %833 = vmatpush3.bf16.msra.mxu0 %v830_v25  ;;  %861 = vmatpush3.bf16.msra.mxu1 %v858_v44 }
  0x93   : > { %835 = vmatprep.subr.bf16.mxu0 %v834_v28  ;;  %863 = vmatprep.subr.bf16.mxu1 %v862_v47 }
  0x96   : > { %837 = vmatpush3.bf16.msra.mxu0 %v834_v28  ;;  %865 = vmatpush3.bf16.msra.mxu1 %v862_v47 }
  0x97   : > { %867 = vmatprep.subr.bf16.mxu1 %v866_v50 }
  0x99   : > { %769 = vmatmul.mubr.f32.vlgmr.msra.gmra.mrb[0].mxu0 %v331_v29 }
  0x9a   : > { %869 = vmatpush3.bf16.msra.mxu1 %v866_v50 }
 0x16c   : > { %v770_v52 = vpop.f32.mrb[0].mxu0 }
 0x16d   : > { %v427_v53 = vadd.f32 %v770_v52, %v692_v51  ;;  %v421_v54 = vpop.f32.mrb[1].mxu0 }
 0x16e   : > { %v422_v55 = vadd.f32 %v692_v51, %v421_v54 }
 0x16f   : > { %v433_v56 = vmul.f32 0.044715, %v427_v53  ;;  %v431_v7 = vmul.f32 0.5, %v427_v53 }
 0x170   : > { %v432_v57 = vmul.f32 0.044715, %v422_v55  ;;  %v430_v5 = vmul.f32 0.5, %v422_v55 }
 0x171   : > { %v435_v58 = vmul.f32 %v433_v56, %v427_v53 }
 0x172   : > { %v434_v59 = vmul.f32 %v432_v57, %v422_v55 }
 0x173   : > { %v437_v60 = vmul.f32 %v435_v58, %v427_v53 }
 0x174   : > { %v436_v61 = vmul.f32 %v434_v59, %v422_v55 }
 0x175   : > { %v439_v62 = vadd.f32 %v437_v60, %v427_v53 }
 0x176   : > { %v438_v63 = vadd.f32 %v436_v61, %v422_v55 }
 0x177   : > { %v441_v0 = vmul.f32 0.7978846, %v439_v62 }
 0x178   : > { %v440_v1 = vmul.f32 0.7978846, %v438_v63 }
 0x179   : > { %954 = vtanh.f32 %v441_v0 }
 0x17a   : > { %956 = vtanh.f32 %v440_v1 }
 0x183   : > { %v955_v2 = vpop.eup %954 }
 0x184   : > { %v957_v3 = vpop.eup %956  ;;  %v445_v4 = vadd.f32 1.0, %v955_v2 }
 0x185   : > { %v444_v6 = vadd.f32 1.0, %v957_v3 }
 0x186   : > { %v447_v9 = vmul.f32 %v445_v4, %v431_v7 }
 0x187   : > { %v446_v8 = vmul.f32 %v444_v6, %v430_v5 }
 0x189   : > { %803 = vmatprep.mubr.f32.mxu1 %v446_v8 }
 0x18a   : > { %804 = vmatmul.mubr.f32.vlgmr.msra.gmra.mrb[0].mxu1 %v447_v9 }
 0x25b   : > { %548 = sbr.rel (%p693_p1) target bundleno = 620 (0x26c), region = 60 }
 0x25d   : > { %v805_v12 = vpop.f32.mrb[0].mxu1 }
 0x25e   : > { %v542_v13 = vadd.f32 %v805_v12, %v449_v10  ;;  %v532_v14 = vpop.f32.mrb[1].mxu1 }
 0x25f   : > { %v541_v15 = vadd.f32 %v532_v14, %v448_v11 }
 0x260   : > { %544 = vst [vmem:[#allocation2 + $0x8] sm:$0xff] %v542_v13 }
 0x261   : > { %543 = vst [vmem:[#allocation2] sm:$0xff] %v541_v15 }
 0x267   : > { %v550_v18 = vld [vmem:[#allocation2 + $0x8] sm:$0xff] }
 0x268   : > { %v549_v16 = vld [vmem:[#allocation2] sm:$0xff]  ;;  %v559_v20 = vadd.f32 %v694_v17, %v550_v18 }
 0x269   : > { %v558_v19 = vadd.f32 %v694_v17, %v549_v16 }
 0x26a   : > { %561 = vst [vmem:[#allocation9 + $0x8] sm:$0xff] %v559_v20 }
 0x26b   : > { %560 = vst [vmem:[#allocation9] sm:$0xff] %v558_v19 }
 0x26c PF: > { %p896_p6 = scmp.eq.s32.totalorder %s1269_s16, 3  ;;  %s1139_s14 = smov [#allocation9]  }
 0x26d   : > { %s571_s28 = sshll.u32 %s1139_s14, 4  ;;  %s572_s28 = int_to_ptr.vmem [resolvable:$true] %s571_s28 }
 0x26e   : > { %s1046_s7 = scalar_lea.vmem %s572_s28, 256  ;;  %p1053_p12 = scmp.lt.s32.totalorder %s572_s28, %s572_s28 }
 0x26f   : > { %p1047_p4 = scmp.ne.s32.totalorder %s572_s28, %s1046_s7  ;;  %p1054_p10 = scmp.lt.s32.totalorder %s1046_s7, %s1046_s7 }
 0x271   : > { %p1048_p7 = pnand %p1047_p4, %p896_p6  ;;  %p1055_p0 = por %p1054_p10, %p1053_p12 }
 0x273   : > { %p1049_p9 = pneg %p1048_p7 }
 0x275   : > { %p1056_p8 = pnand %p1055_p0, %p1049_p9 }
 0x277   : > { %1059 = shalt.err (!%p1056_p8)
}
 0x278   : > { %s1060_s27 = scalar_lea.hbm %s1468_s5, 256 }
 0x279   : > { %p1061_p13 = scmp.ne.s32.totalorder %s1468_s5, %s1060_s27  ;;  %p1066_p5 = scmp.lt.u32.totalorder %s1060_s27, %s1468_s5 }
 0x27b   : > { %p1062_p2 = pnand %p1061_p13, %p896_p6 }
 0x27d   : > { %p1063_p3 = pneg %p1062_p2 }
 0x27f   : > { %p1068_p11 = pnand %p1066_p5, %p1063_p3 }
 0x281   : > { %1071 = shalt.err (!%p1068_p11)
}
 0x282   : > { %s1140_s15 = smov 128   ;;  %s1141_s25 = smov 8  }
 0x283   : > { %879 = dma.vmem_to_hbm [thread:$0]  (%p896_p6), %s572_s28, 256, %s1468_s5, [#allocation5], %s1140_s15, %s1140_s15, %s1141_s25  }
 0x284   : > { %1105 = dma.done.wait (%p896_p6), [#allocation5], 256  }
 0x285   : > { %1107 = vsyncadd (%p896_p6), [#allocation5], 4294967040 }
 0x286 PF: > { %s20_s23 = sadd.s32 1, %s1130_s23   ;;  %s1481_s18 = smov %s1114_s19 }
 0x287   : > { %p17_p1 = scmp.ge.s32.totalorder %s20_s23, 6   ;;  %s1482_s19 = smov %s1118_s20 }
 0x288   : > { %s1483_s20 = smov %s1219_s30  ;;  %s1484_s21 = smov %s1126_s22 }
 0x289   : > { %s1485_s22 = smov %s1487_s24  ;;  %19 = sbr.rel (!%p17_p1) target bundleno = 6 (0x6), region = 106 }
 0x290   :  { %587 = vsyncpa [#allocation4], 1 }
 0x291   :  { %589 = vsyncpa [#allocation4 + $0x1], 1 }
 0x292   :  { %590 = vsyncpa [#allocation7], 1 }
 0x293   :  { %592 = vsyncpa [#allocation7 + $0x1], 1 }
 0x294   :  { %593 = vsyncpa [#allocation5], 1 }
 0x295   :  { %595 = vsyncpa [#allocation5 + $0x1], 1 }

</bundles_post_ra>
